<compile_context>
chip_gen: v7x
topology: tpu7x:2x2x1
jax: 0.10.0
libtpu: 0.0.40
codegen_flags: <defaults>
</compile_context>

<pallas_src>
import functools

import jax
import jax.numpy as jnp
from jax import lax
from jax.experimental import pallas as pl
from jax.experimental.pallas import tpu as pltpu


# ---------------------------------------------------------------------------
# Model config (small synthetic shapes)
# ---------------------------------------------------------------------------
B = 2
C, H, W = 3, 16, 16
PATCH = 8
N_PATCH = (H // PATCH) * (W // PATCH)        # 4 tokens per image
PATCH_DIM = C * PATCH * PATCH                # 192
VISION_WIDTH = 64
TEXT_WIDTH = 48
EMBED_DIM = 32
SEQ_LEN = 8
VOCAB = 100

# Lane-dense packed output slab: [ img_embed (64) | txt_embed (32) | zeros (32) ]
OUT_PAD = 128
_IMG_LO, _IMG_HI = 0, VISION_WIDTH
_TXT_LO, _TXT_HI = VISION_WIDTH, VISION_WIDTH + EMBED_DIM
_PAD_LANES = OUT_PAD - _TXT_HI


# ---------------------------------------------------------------------------
# Fused Pallas kernel (4 operands, 1 full-width store, no grid)
# ---------------------------------------------------------------------------
def _clip_fused_kernel(img_in_ref, patch_w_ref, txt_in_ref, txt_proj_ref,
                       out_ref):
    """Fused CLIP forward head.

    vision: pooled-patch matmul  [B,192]@[192,64]  -> L2 norm
    text:   text-projection matmul [B,48]@[48,32]  -> L2 norm
    Both normalized embeddings are packed into one lane-dense (B, 128) slab
    and written with a single unmasked vector store.
    """
    eps = 1e-12  # F.normalize default eps

    img = jnp.dot(img_in_ref[...], patch_w_ref[...],
                  preferred_element_type=jnp.float32)             # [B, Dv]
    txt = jnp.dot(txt_in_ref[...], txt_proj_ref[...],
                  preferred_element_type=jnp.float32)             # [B, E]

    # F.normalize(x, dim=-1) == x / max(||x||, eps)
    #                        == x * rsqrt(max(sum(x^2), eps^2))
    # (rsqrt uses the otherwise-idle EUP slot)
    img_ss = jnp.sum(img * img, axis=-1, keepdims=True)
    img_n = img * lax.rsqrt(jnp.maximum(img_ss, eps * eps))
    txt_ss = jnp.sum(txt * txt, axis=-1, keepdims=True)
    txt_n = txt * lax.rsqrt(jnp.maximum(txt_ss, eps * eps))

    # Single full-lane-width store (zeros in lanes 96..127 cost nothing extra).
    pad = jnp.zeros((img_n.shape[0], _PAD_LANES), jnp.float32)
    out_ref[...] = jnp.concatenate([img_n, txt_n, pad], axis=-1)


def _clip_fused_call(img_pooled, patch_w, txt_pooled, txt_proj):
    """Single grid-less pallas_call; every operand fits VMEM as one block."""
    vmem = pl.BlockSpec(memory_space=pltpu.MemorySpace.VMEM)
    flops = 2 * B * PATCH_DIM * VISION_WIDTH + 2 * B * TEXT_WIDTH * EMBED_DIM
    bytes_accessed = 4 * (img_pooled.size + patch_w.size
                          + txt_pooled.size + txt_proj.size + B * OUT_PAD)
    return pl.pallas_call(
        _clip_fused_kernel,
        out_shape=jax.ShapeDtypeStruct((B, OUT_PAD), jnp.float32),
        in_specs=[vmem] * 4,
        out_specs=vmem,
        cost_estimate=pl.CostEstimate(flops=flops,
                                      transcendentals=2 * B,
                                      bytes_accessed=bytes_accessed),
    )(img_pooled, patch_w, txt_pooled, txt_proj)


# ---------------------------------------------------------------------------
# Params (deterministic init)
# ---------------------------------------------------------------------------
def trunc_normal(key, shape, std):
    return jax.random.truncated_normal(key, -2.0, 2.0, shape, jnp.float32) * std


def init_params(key):
    k = jax.random.split(key, 4)
    return dict(
        patch_w=trunc_normal(k[0], (PATCH_DIM, VISION_WIDTH), PATCH_DIM ** -0.5),
        token_emb=trunc_normal(k[1], (VOCAB, TEXT_WIDTH), 0.02),
        # image_projection is a module parameter, but CLIP.forward discards
        # the projected image tokens (`image_embed, _ = self.encode_image(...)`),
        # so it is never multiplied here.
        image_projection=trunc_normal(k[2], (VISION_WIDTH, EMBED_DIM),
                                      VISION_WIDTH ** -0.5),
        text_projection=trunc_normal(k[3], (TEXT_WIDTH, EMBED_DIM),
                                     TEXT_WIDTH ** -0.5),
        logit_scale=jnp.asarray(jnp.log(1.0 / 0.07), jnp.float32),
    )


# ---------------------------------------------------------------------------
# Glue (layout + mean-pools, fused by XLA) + jitted forward
# ---------------------------------------------------------------------------
def patchify_nchw(image):
    # [B, C, H, W] -> [B, N, C*p*p]
    b, c, h, w = image.shape
    x = image.reshape(b, c, h // PATCH, PATCH, w // PATCH, PATCH)
    x = x.transpose(0, 2, 4, 1, 3, 5)        # [B, H/p, W/p, C, p, p]
    return x.reshape(b, (h // PATCH) * (w // PATCH), c * PATCH * PATCH)


@functools.partial(jax.jit, static_argnames=("eval_mode",))
def clip_forward(params, image, slow, text, eval_mode=False):
    """CLIP.forward: (normalize(img_embed), normalize(txt_embed), logit_scale.exp())."""
    del slow, eval_mode  # `slow` is unused by CLIP.forward (as in the reference).

    # Vision encoder front-end: patchify + mean-pool over patches (pure layout
    # + tiny reduce, fused by XLA).  mean(patches) @ W == mean(patches @ W).
    img_pooled = patchify_nchw(image).mean(axis=1)               # [B, 192]

    # Text encoder front-end: token-embedding gather + mean-pool over tokens.
    txt_pooled = jnp.take(params["token_emb"], text, axis=0).mean(axis=1)  # [B, 48]

    # NOTE: the reference's `x @ image_projection` is discarded by forward, so
    # it is not computed.
    out = _clip_fused_call(img_pooled, params["patch_w"],
                           txt_pooled, params["text_projection"])
    img_n = out[:, _IMG_LO:_IMG_HI]
    txt_n = out[:, _TXT_LO:_TXT_HI]

    # Temperature: logit_scale.exp() — scalar, computed in the wrapper.
    scale = jnp.exp(params["logit_scale"])
    return img_n, txt_n, scale


def clip_forward_ref(params, image, slow, text):
    """Pure-JAX reference of the same forward (token-then-pool order)."""
    del slow
    patches = patchify_nchw(image).astype(jnp.float32)           # [B, N, 192]
    tokens = patches.reshape(B * N_PATCH, PATCH_DIM) @ params["patch_w"]
    pooled = tokens.reshape(B, N_PATCH, VISION_WIDTH).mean(axis=1)
    txt_emb = jnp.take(params["token_emb"], text, axis=0)
    txt = txt_emb.mean(axis=1) @ params["text_projection"]

    def l2n(x):
        return x / jnp.maximum(jnp.linalg.norm(x, axis=-1, keepdims=True), 1e-12)

    return l2n(pooled), l2n(txt), jnp.exp(params["logit_scale"])


if __name__ == "__main__":
    key = jax.random.PRNGKey(0)
    k_param, k_img, k_slow, k_txt = jax.random.split(key, 4)

    params = init_params(k_param)
    image = jax.random.normal(k_img, (B, C, H, W), jnp.float32)      # NCHW
    slow = jax.random.normal(k_slow, (B, C, H, W), jnp.float32)      # unused
    text = jax.random.randint(k_txt, (B, SEQ_LEN), 0, VOCAB, jnp.int32)

    img_n, txt_n, scale = jax.block_until_ready(
        clip_forward(params, image, slow, text))

    ref_img, ref_txt, ref_scale = clip_forward_ref(params, image, slow, text)
    assert img_n.shape == (B, VISION_WIDTH)
    assert txt_n.shape == (B, EMBED_DIM)
    assert jnp.allclose(img_n, ref_img, atol=1e-5, rtol=1e-5)
    assert jnp.allclose(txt_n, ref_txt, atol=1e-5, rtol=1e-5)
    assert jnp.allclose(scale, ref_scale, atol=1e-6, rtol=1e-6)

    print("KERNEL_OK")
</pallas_src>

<mosaic_0001>
module attributes {stable_mosaic.version = 11 : i64} {
  func.func @_clip_fused_kernel(%arg0: memref<2x192xf32, #tpu.memory_space<vmem>>, %arg1: memref<192x64xf32, #tpu.memory_space<vmem>>, %arg2: memref<2x48xf32, #tpu.memory_space<vmem>>, %arg3: memref<48x32xf32, #tpu.memory_space<vmem>>, %arg4: memref<2x128xf32, #tpu.memory_space<vmem>>) attributes {dimension_semantics = [], scalar_prefetch = 0 : i64, scratch_operands = 0 : i64, tpu.core_type = #tpu.core_type<tc>} {
    %c0 = arith.constant 0 : index
    %c0_0 = arith.constant 0 : index
    %0 = vector.load %arg0[%c0, %c0_0] : memref<2x192xf32, #tpu.memory_space<vmem>>, vector<2x192xf32>
    %c0_1 = arith.constant 0 : index
    %c0_2 = arith.constant 0 : index
    %1 = vector.load %arg1[%c0_1, %c0_2] : memref<192x64xf32, #tpu.memory_space<vmem>>, vector<192x64xf32>
    %cst = arith.constant dense<0.000000e+00> : vector<2x64xf32>
    %2 = tpu.matmul %0, %1, %cst {dimension_numbers = #tpu.dot_dimension_numbers<[1], [0], [0], [1], [0, 0, 1, 1], [], []>} : vector<2x192xf32>, vector<192x64xf32>, vector<2x64xf32> -> vector<2x64xf32>
    %c0_3 = arith.constant 0 : index
    %c0_4 = arith.constant 0 : index
    %3 = vector.load %arg2[%c0_3, %c0_4] : memref<2x48xf32, #tpu.memory_space<vmem>>, vector<2x48xf32>
    %c0_5 = arith.constant 0 : index
    %c0_6 = arith.constant 0 : index
    %4 = vector.load %arg3[%c0_5, %c0_6] : memref<48x32xf32, #tpu.memory_space<vmem>>, vector<48x32xf32>
    %cst_7 = arith.constant dense<0.000000e+00> : vector<2x32xf32>
    %5 = tpu.matmul %3, %4, %cst_7 {dimension_numbers = #tpu.dot_dimension_numbers<[1], [0], [0], [1], [0, 0, 1, 1], [], []>} : vector<2x48xf32>, vector<48x32xf32>, vector<2x32xf32> -> vector<2x32xf32>
    %6 = arith.mulf %2, %2 : vector<2x64xf32>
    %cst_8 = arith.constant dense<0.000000e+00> : vector<2xf32>
    %7 = vector.multi_reduction <add>, %6, %cst_8 [1] : vector<2x64xf32> to vector<2xf32>
    %8 = vector.shape_cast %7 : vector<2xf32> to vector<2x1xf32>
    %cst_9 = arith.constant 1.000000e-24 : f32
    %9 = vector.broadcast %cst_9 : f32 to vector<2x1xf32>
    %10 = arith.maximumf %8, %9 : vector<2x1xf32>
    %11 = math.rsqrt %10 : vector<2x1xf32>
    %12 = vector.broadcast %11 : vector<2x1xf32> to vector<2x64xf32>
    %13 = arith.mulf %2, %12 : vector<2x64xf32>
    %14 = arith.mulf %5, %5 : vector<2x32xf32>
    %cst_10 = arith.constant dense<0.000000e+00> : vector<2xf32>
    %15 = vector.multi_reduction <add>, %14, %cst_10 [1] : vector<2x32xf32> to vector<2xf32>
    %16 = vector.shape_cast %15 : vector<2xf32> to vector<2x1xf32>
    %cst_11 = arith.constant 1.000000e-24 : f32
    %17 = vector.broadcast %cst_11 : f32 to vector<2x1xf32>
    %18 = arith.maximumf %16, %17 : vector<2x1xf32>
    %19 = math.rsqrt %18 : vector<2x1xf32>
    %20 = vector.broadcast %19 : vector<2x1xf32> to vector<2x32xf32>
    %21 = arith.mulf %5, %20 : vector<2x32xf32>
    %cst_12 = arith.constant 0.000000e+00 : f32
    %22 = vector.broadcast %cst_12 : f32 to vector<2x32xf32>
    %23 = tpu.concatenate %13, %21, %22 in 1 : vector<2x64xf32>, vector<2x32xf32>, vector<2x32xf32> -> vector<2x128xf32>
    %c0_13 = arith.constant 0 : index
    %c0_14 = arith.constant 0 : index
    %24 = vector.load %arg4[%c0_13, %c0_14] : memref<2x128xf32, #tpu.memory_space<vmem>>, vector<2x128xf32>
    tpu.vector_store %arg4[%c0_13, %c0_14], %23 {strides = array<i32>} : memref<2x128xf32, #tpu.memory_space<vmem>>, vector<2x128xf32>,
    return
  }
}

</mosaic_0001>

<bundles_post_ra>
// kernel: clip_forward.1
= control target key start
LH: loop header
LB: loop body
LE: loop exit
PB: predicated region body
PF: predicated region fallthrough
CT: control target
= control target key end

     0   :  { %v312_v0 = vmov 0.0|0.0   ;;  %vm313_vm0 = vmmov 0   ;;  %v314_v8 = vmov 0.0   ;;  %vm52_vm1 = vcmask 523264   ;;  %s457_s1 = inlined_call_operand.vmem [shape: f32[192,64], index: 1, kind: input, shape index: {}]   ;;  %s458_s3 = inlined_call_operand.vmem [shape: f32[48,32], index: 3, kind: input, shape index: {}]   ;;  %s459_s0 = inlined_call_operand.vmem [shape: f32[2,192], index: 0, kind: input, shape index: {}]   ;;  %s460_s2 = inlined_call_operand.vmem [shape: f32[2,48], index: 2, kind: input, shape index: {}]   ;;  %s461_s4 = inlined_call_operand.vmem [shape: f32[2,128], index: 4, kind: output, shape index: {}]  }
   0x1   :  { %259 = vmatprep.subr.bf16.mxu0 %v312_v0  ;;  %295 = vmatprep.subr.bf16.mxu1 %v312_v0  ;;  %v18_v1 = vld [vmem:[%s457_s1] sm:$0xff]  ;;  %v19_v2 = vld [vmem:[%s457_s1 + $0x8] sm:$0xff]  ;;  %v20_v6 = vld [vmem:[%s457_s1 + $0x10] sm:$0xff]  ;;  %vm132_vm2 = vcmask 392192   ;;  %vm215_vm3 = vcmask 254976   ;;  %vm207_vm4 = vcmask 517120  }
   0x2   :  { %v126_v3 = vld [vmem:[%s458_s3] sm:$0xff]  ;;  %v260_v4 = vpack.c.bf16 %v19_v2, %v18_v1  ;;  %v127_v5 = vld [vmem:[%s458_s3 + $0x8] sm:$0xff]  ;;  %v21_v7 = vld [vmem:[%s457_s1 + $0x18] sm:$0xff]  ;;  %256 = vmatprep.mubr.msk.f32.mxu1 %vm313_vm0, %v314_v8  ;;  %vm227_vm5 = vcmask 785408  }
   0x3   :  { %v296_v9 = vpack.c.bf16 %v127_v5, %v126_v3  ;;  %v128_v10 = vld [vmem:[%s458_s3 + $0x10] sm:$0xff]  ;;  %v129_v11 = vld [vmem:[%s458_s3 + $0x18] sm:$0xff]  ;;  %v263_v12 = vpack.c.bf16 %v21_v7, %v20_v6  ;;  %v22_v14 = vld [vmem:[%s457_s1 + $0x20] sm:$0xff] }
   0x4   :  { %261 = vmatpush1.bf16.msra.mxu0 %v260_v4  ;;  %v299_v13 = vpack.c.bf16 %v129_v11, %v128_v10  ;;  %v23_v15 = vld [vmem:[%s457_s1 + $0x28] sm:$0xff]  ;;  %v130_v16 = vld [vmem:[%s458_s3 + $0x20] sm:$0xff]  ;;  %v24_v20 = vld [vmem:[%s457_s1 + $0x30] sm:$0xff] }
   0x5   :  { %297 = vmatpush3.bf16.msra.mxu1 %v296_v9  ;;  %262 = vmatprep.subr.bf16.mxu0 %v312_v0  ;;  %v131_v17 = vld [vmem:[%s458_s3 + $0x28] sm:$0xff]  ;;  %v266_v18 = vpack.c.bf16 %v23_v15, %v22_v14  ;;  %v25_v21 = vld [vmem:[%s457_s1 + $0x38] sm:$0xff]  ;;  %v234_v22 = vld.sshfl [vmem:[%s459_s0] sm:$0x33 pattern:$0x76325410] }
   0x6   :  { %298 = vmatprep.subr.bf16.mxu1 %v312_v0  ;;  %v302_v19 = vpack.c.bf16 %v131_v17, %v130_v16  ;;  %v269_v23 = vpack.c.bf16 %v25_v21, %v24_v20  ;;  %v50_v24 = vcombine.high %v234_v22, %v234_v22  ;;  %v125_v25 = vld [vmem:[%s460_s2] sm:$0x3]  ;;  %v27_v27 = vld [vmem:[%s457_s1 + $0x48] sm:$0xff]  ;;  %v28_v29 = vld [vmem:[%s457_s1 + $0x50] sm:$0xff] }
   0x7   :  { %v26_v26 = vld [vmem:[%s457_s1 + $0x40] sm:$0xff]  ;;  %v29_v30 = vld [vmem:[%s457_s1 + $0x58] sm:$0xff]  ;;  %v31_v33 = vld [vmem:[%s457_s1 + $0x68] sm:$0xff] }
   0x8   :  { %264 = vmatpush1.bf16.msra.mxu0 %v263_v12  ;;  %235 = vmatprep.mubr.msk.f32.mxu0 %vm52_vm1, %v50_v24  ;;  %v272_v28 = vpack.c.bf16 %v27_v27, %v26_v26  ;;  %v275_v31 = vpack.c.bf16 %v29_v30, %v28_v29  ;;  %v30_v32 = vld [vmem:[%s457_s1 + $0x60] sm:$0xff]  ;;  %v32_v35 = vld [vmem:[%s457_s1 + $0x70] sm:$0xff]  ;;  %v33_v36 = vld [vmem:[%s457_s1 + $0x78] sm:$0xff] }
   0x9   :  { %300 = vmatpush3.bf16.msra.mxu1 %v299_v13  ;;  %265 = vmatprep.subr.bf16.mxu0 %v312_v0  ;;  %v278_v34 = vpack.c.bf16 %v31_v33, %v30_v32  ;;  %v281_v37 = vpack.c.bf16 %v33_v36, %v32_v35  ;;  %v34_v38 = vld [vmem:[%s457_s1 + $0x80] sm:$0xff]  ;;  %v35_v39 = vld [vmem:[%s457_s1 + $0x88] sm:$0xff]  ;;  %v36_v41 = vld [vmem:[%s457_s1 + $0x90] sm:$0xff] }
   0xa   :  { %301 = vmatprep.subr.bf16.mxu1 %v312_v0  ;;  %v284_v40 = vpack.c.bf16 %v35_v39, %v34_v38  ;;  %v37_v42 = vld [vmem:[%s457_s1 + $0x98] sm:$0xff]  ;;  %v38_v44 = vld [vmem:[%s457_s1 + $0xa0] sm:$0xff]  ;;  %v39_v45 = vld [vmem:[%s457_s1 + $0xa8] sm:$0xff] }
   0xb   :  { %v287_v43 = vpack.c.bf16 %v37_v42, %v36_v41  ;;  %v290_v46 = vpack.c.bf16 %v39_v45, %v38_v44  ;;  %v40_v47 = vld [vmem:[%s457_s1 + $0xb0] sm:$0xff]  ;;  %v41_v48 = vld [vmem:[%s457_s1 + $0xb8] sm:$0xff]  ;;  %s315_s1 = smov 64  }
   0xc   :  { %267 = vmatpush1.bf16.msra.mxu0 %v266_v18  ;;  %v293_v49 = vpack.c.bf16 %v41_v48, %v40_v47 }
   0xd   :  { %303 = vmatpush3.bf16.msra.mxu1 %v302_v19  ;;  %268 = vmatprep.subr.bf16.mxu0 %v312_v0 }
  0x10   :  { %257 = vmatmul.mubr.msk.f32.vlgmr.msra.gmra.mrb[0].mxu1 %vm132_vm2, %v125_v25  ;;  %270 = vmatpush1.bf16.msra.mxu0 %v269_v23 }
  0x11   :  { %271 = vmatprep.subr.bf16.mxu0 %v312_v0 }
  0x14   :  { %273 = vmatpush1.bf16.msra.mxu0 %v272_v28 }
  0x15   :  { %274 = vmatprep.subr.bf16.mxu0 %v312_v0 }
  0x18   :  { %276 = vmatpush1.bf16.msra.mxu0 %v275_v31 }
  0x19   :  { %277 = vmatprep.subr.bf16.mxu0 %v312_v0 }
  0x1c   :  { %279 = vmatpush1.bf16.msra.mxu0 %v278_v34 }
  0x1d   :  { %280 = vmatprep.subr.bf16.mxu0 %v312_v0 }
  0x20   :  { %282 = vmatpush1.bf16.msra.mxu0 %v281_v37 }
  0x21   :  { %283 = vmatprep.subr.bf16.mxu0 %v312_v0 }
  0x24   :  { %285 = vmatpush1.bf16.msra.mxu0 %v284_v40 }
  0x25   :  { %286 = vmatprep.subr.bf16.mxu0 %v312_v0 }
  0x28   :  { %288 = vmatpush1.bf16.msra.mxu0 %v287_v43 }
  0x29   :  { %289 = vmatprep.subr.bf16.mxu0 %v312_v0 }
  0x2c   :  { %291 = vmatpush1.bf16.msra.mxu0 %v290_v46 }
  0x2d   :  { %292 = vmatprep.subr.bf16.mxu0 %v312_v0 }
  0x30   :  { %294 = vmatpush1.bf16.msra.mxu0 %v293_v49 }
  0x33   :  { %120 = vmatmul.mubr.f32.vlgmr.msra.gmra.mrb[0].mxu0 %v234_v22 }
  0xe3   :  { %v202_v50 = vpop.f32.mrb[0].mxu1 }
  0xe4   :  { %v258_v51 = vpop.f32.mrb[1].mxu1  ;;  %v214_v52 = vmul.f32 %v202_v50, %v202_v50 }
  0xe6   :  { %v216_v53 = vsel %vm215_vm3, %v214_v52, 0.0 }
  0xe7   :  { %217 = vadd.xlane.f32.xlu0 %v216_v53 }
 0x106   :  { %v121_v54 = vpop.f32.mrb[0].mxu0 }
 0x107   :  { %v206_v55 = vmul.f32 %v121_v54, %v121_v54  ;;  %v123_v56 = vpop.f32.mrb[1].mxu0 }
 0x109   :  { %v208_v57 = vsel %vm207_vm4, %v206_v55, 0.0 }
 0x10a   :  { %209 = vadd.xlane.f32.xlu0 %v208_v57 }
 0x174   :  { %v218_v58 = vpop.xlane.xlu0 %217 }
 0x175   :  { %v219_v59 = vmax.f32 %v218_v58, 1e-24 }
 0x177   :  { %308 = vrsqrt.f32 %v219_v59 }
 0x181   :  { %v309_v60 = vpop.eup %308 }
 0x182   :  { %v221_v61 = vmul.f32 %v309_v60, %v202_v50 }
 0x184   :  { %223 = vrot.lane.b32.xlu1 %v221_v61, %s315_s1 }
 0x197   :  { %v210_v62 = vpop.xlane.xlu0 %209 }
 0x198   :  { %v211_v63 = vmax.f32 %v210_v62, 1e-24 }
 0x19a   :  { %310 = vrsqrt.f32 %v211_v63 }
 0x1a4   :  { %v311_v0 = vpop.eup %310 }
 0x1a5   :  { %v213_v1 = vmul.f32 %v311_v0, %v121_v54 }
 0x1f6   :  { %v224_v2 = vpop.permute.xlu1 %223 }
 0x1f7   :  { %v226_v3 = vsel %vm52_vm1, %v213_v1, %v224_v2 }
 0x1f8   :  { %v228_v4 = vsel %vm227_vm5, %v226_v3, 0.0 }
 0x1f9   :  { %229 = vst [vmem:[%s461_s4] sm:$0x3] %v228_v4 }

</bundles_post_ra>
